<compile_context>
chip_gen: v5e
topology: v5e:2x2
jax: 0.10.0
libtpu: 0.0.40
codegen_flags: <defaults>
</compile_context>

<pallas_src>
import functools

import jax
import jax.numpy as jnp
from jax.experimental import pallas as pl
from jax.experimental.pallas import tpu as pltpu


def _ffn_kernel(x_ref, w1_ref, b1_ref, w2_ref, b2_ref, o_ref, acc_ref):
    # x_ref:  (tm, dim)   row tile of activations
    # w1_ref: (dim, tk)   chunk of W1 columns
    # b1_ref: (1, tk)     matching b1 chunk
    # w2_ref: (tk, dim)   chunk of W2 rows
    # b2_ref: (1, dim)
    # o_ref:  (tm, dim)   output tile (resident across the hidden axis)
    # acc_ref:(tm, dim)   f32 accumulator scratch
    k = pl.program_id(1)

    @pl.when(k == 0)
    def _init():
        # Fold the second bias into the accumulator once per output tile.
        acc_ref[...] = jnp.broadcast_to(
            b2_ref[...].astype(jnp.float32), acc_ref.shape)

    # Linear 1 chunk on the MXU (native dtype in, f32 accumulate) + bias + ReLU.
    h = jnp.dot(x_ref[...], w1_ref[...], preferred_element_type=jnp.float32)
    h = jnp.maximum(h + b1_ref[...].astype(jnp.float32), 0.0)

    # Dropout: identity in eval mode.
    # TODO(synk): training-mode dropout (pltpu.prng_seed with a grid-step
    # dependent seed + pltpu.prng_random_bits mask) not emitted.

    # Linear 2 chunk, accumulated in f32. Cast h to the weight dtype so the
    # second matmul runs at bf16 MXU rate when weights are bf16.
    acc_ref[...] += jnp.dot(h.astype(w2_ref.dtype), w2_ref[...],
                            preferred_element_type=jnp.float32)

    @pl.when(k == pl.num_programs(1) - 1)
    def _finalize():
        o_ref[...] = acc_ref[...].astype(o_ref.dtype)


def _round_up(v, mult):
    return ((v + mult - 1) // mult) * mult


def _estimate_vmem(tm, tk, dim_p, a_bytes, w_bytes, o_bytes):
    # Double-buffered pipeline blocks + the resident f32 accumulator.
    return (2 * (tm * dim_p * a_bytes       # x tile
                 + dim_p * tk * w_bytes     # W1 chunk
                 + tk * w_bytes             # b1 chunk
                 + tk * dim_p * w_bytes     # W2 chunk
                 + dim_p * w_bytes          # b2
                 + tm * dim_p * o_bytes)    # out tile
            + tm * dim_p * 4)               # accumulator scratch


_VMEM_BUDGET = 40 << 20   # conservative: leaves headroom even on v7x (64 MiB/TC)


def _pick_tiles(m, dim_p, hidden_p, a_bytes, w_bytes, o_bytes):
    # Row tile: as large as useful (amortizes weight re-streaming across M).
    if m >= 1024:
        tm = 512
    elif m >= 256:
        tm = 256
    else:
        tm = max(8, _round_up(m, 8))
    # Hidden chunk: largest lane-aligned size that divides the padded hidden dim.
    tk_opts = [t for t in (512, 384, 256, 128) if hidden_p % t == 0]
    tk = tk_opts[0]
    # Shrink until the pipeline fits the VMEM budget.
    while _estimate_vmem(tm, tk, dim_p, a_bytes, w_bytes, o_bytes) > _VMEM_BUDGET:
        smaller_tk = [t for t in tk_opts if t < tk]
        if smaller_tk:
            tk = smaller_tk[0]
        elif tm > 8:
            tm = max(8, tm // 2)
        else:
            break
    return tm, tk


@functools.partial(jax.jit, static_argnames=("tile_m", "tile_k"))
def feed_forward(x, w1, b1, w2, b2, *, tile_m=None, tile_k=None):
    """x: (batch, seq, dim) -> (batch, seq, dim).

    Weights are stored pre-transposed vs. PyTorch:
      w1: (dim, hidden), b1: (hidden,), w2: (hidden, dim), b2: (dim,)
    so the kernel computes relu(x @ w1 + b1) @ w2 + b2.
    """
    batch, seq, dim = x.shape
    hidden = w1.shape[1]
    m = batch * seq

    a_bytes = jnp.dtype(x.dtype).itemsize
    w_bytes = jnp.dtype(w1.dtype).itemsize

    # Pad feature / hidden axes to lane multiples: (8,128)-aligned blocks,
    # lane-dense output stores, and a hidden chunk size that always divides.
    dim_p = _round_up(dim, 128)
    hidden_p = _round_up(hidden, 128)

    tm, tk = _pick_tiles(m, dim_p, hidden_p, a_bytes, w_bytes, a_bytes)
    if tile_m is not None:
        tm = tile_m
    if tile_k is not None:
        tk = tile_k
    assert hidden_p % tk == 0, "tile_k must divide the padded hidden dim"
    m_pad = _round_up(m, tm)

    x2d = x.reshape(m, dim)
    if m_pad != m or dim_p != dim:
        x2d = jnp.pad(x2d, ((0, m_pad - m), (0, dim_p - dim)))
    if dim_p != dim or hidden_p != hidden:
        w1 = jnp.pad(w1, ((0, dim_p - dim), (0, hidden_p - hidden)))
        w2 = jnp.pad(w2, ((0, hidden_p - hidden), (0, dim_p - dim)))
        b1 = jnp.pad(b1, (0, hidden_p - hidden))
        b2 = jnp.pad(b2, (0, dim_p - dim))
    b1_2d = b1.reshape(1, hidden_p)
    b2_2d = b2.reshape(1, dim_p)

    grid = (m_pad // tm, hidden_p // tk)   # hidden (reduction) axis last

    est = _estimate_vmem(tm, tk, dim_p, a_bytes, w_bytes, a_bytes)
    vmem_limit = int(min(max(est + (8 << 20), 32 << 20), 48 << 20))

    out2d = pl.pallas_call(
        _ffn_kernel,
        out_shape=jax.ShapeDtypeStruct((m_pad, dim_p), x.dtype),
        grid_spec=pltpu.PrefetchScalarGridSpec(
            num_scalar_prefetch=0,
            grid=grid,
            in_specs=[
                pl.BlockSpec((tm, dim_p), lambda i, k: (i, 0)),   # x rows
                pl.BlockSpec((dim_p, tk), lambda i, k: (0, k)),   # W1 chunk
                pl.BlockSpec((1, tk), lambda i, k: (0, k)),       # b1 chunk
                pl.BlockSpec((tk, dim_p), lambda i, k: (k, 0)),   # W2 chunk
                pl.BlockSpec((1, dim_p), lambda i, k: (0, 0)),    # b2
            ],
            out_specs=pl.BlockSpec((tm, dim_p), lambda i, k: (i, 0)),
            scratch_shapes=[pltpu.VMEM((tm, dim_p), jnp.float32)],
        ),
        compiler_params=pltpu.CompilerParams(
            dimension_semantics=("parallel", "arbitrary"),
            vmem_limit_bytes=vmem_limit),
    )(x2d, w1, b1_2d, w2, b2_2d)

    return out2d[:m, :dim].reshape(batch, seq, dim)


def _init_params(key, dim, hidden_dim, dtype=jnp.float32):
    # Deterministic init mimicking nn.Linear's U(-1/sqrt(fan_in), 1/sqrt(fan_in)).
    k1, k2, k3, k4 = jax.random.split(key, 4)
    lim1 = 1.0 / (dim ** 0.5)
    lim2 = 1.0 / (hidden_dim ** 0.5)
    w1 = jax.random.uniform(k1, (dim, hidden_dim), dtype, -lim1, lim1)
    b1 = jax.random.uniform(k2, (hidden_dim,), dtype, -lim1, lim1)
    w2 = jax.random.uniform(k3, (hidden_dim, dim), dtype, -lim2, lim2)
    b2 = jax.random.uniform(k4, (dim,), dtype, -lim2, lim2)
    return w1, b1, w2, b2


def _ref_ffn(x, w1, b1, w2, b2):
    # Pure-JAX reference (eval-mode dropout == identity).
    return jnp.maximum(x @ w1 + b1, 0.0) @ w2 + b2


if __name__ == "__main__":
    key = jax.random.PRNGKey(0)
    kx, kp, kx2, kp2 = jax.random.split(key, 4)

    # Aligned small shapes; force tile_k=128 so the hidden-reduction axis runs
    # >1 step (exercises the accumulator init / finalize paths).
    batch, seq, dim, hidden_dim = 2, 8, 128, 256
    x = jax.random.normal(kx, (batch, seq, dim), jnp.float32)
    w1, b1, w2, b2 = _init_params(kp, dim, hidden_dim)

    out = jax.block_until_ready(feed_forward(x, w1, b1, w2, b2, tile_k=128))
    out_auto = jax.block_until_ready(feed_forward(x, w1, b1, w2, b2))
    ref = _ref_ffn(x, w1, b1, w2, b2)
    assert out.shape == (batch, seq, dim)
    assert jnp.allclose(out, ref, atol=1e-4, rtol=1e-4)
    assert jnp.allclose(out_auto, ref, atol=1e-4, rtol=1e-4)

    # Unaligned shapes exercise the row / feature / hidden zero-padding paths.
    batch2, seq2, dim2, hidden2 = 3, 5, 96, 200
    x2 = jax.random.normal(kx2, (batch2, seq2, dim2), jnp.float32)
    w1b, b1b, w2b, b2b = _init_params(kp2, dim2, hidden2)
    out2 = jax.block_until_ready(feed_forward(x2, w1b, b1b, w2b, b2b))
    ref2 = _ref_ffn(x2, w1b, b1b, w2b, b2b)
    assert out2.shape == (batch2, seq2, dim2)
    assert jnp.allclose(out2, ref2, atol=1e-4, rtol=1e-4)

    print("KERNEL_OK")
</pallas_src>

<mosaic_0001>
module attributes {stable_mosaic.version = 11 : i64} {
  func.func @_ffn_kernel(%arg0: i32, %arg1: i32, %arg2: memref<16x128xf32, #tpu.memory_space<vmem>>, %arg3: memref<128x128xf32, #tpu.memory_space<vmem>>, %arg4: memref<1x128xf32, #tpu.memory_space<vmem>>, %arg5: memref<128x128xf32, #tpu.memory_space<vmem>>, %arg6: memref<1x128xf32, #tpu.memory_space<vmem>>, %arg7: memref<16x128xf32, #tpu.memory_space<vmem>>, %arg8: memref<16x128xf32, #tpu.memory_space<vmem>>) attributes {dimension_semantics = [#tpu.dimension_semantics<parallel>, #tpu.dimension_semantics<arbitrary>], iteration_bounds = array<i64: 1, 2>, scalar_prefetch = 0 : i64, scratch_operands = 1 : i64, tpu.core_type = #tpu.core_type<tc>, window_params = [{transform_indices = @transform_0, window_bounds = array<i64: 16, 128>}, {transform_indices = @transform_1, window_bounds = array<i64: 128, 128>}, {transform_indices = @transform_2, window_bounds = array<i64: 1, 128>}, {transform_indices = @transform_3, window_bounds = array<i64: 128, 128>}, {pipeline_mode = #tpu.pipeline_mode<synchronous>, transform_indices = @transform_4, window_bounds = array<i64: 1, 128>}, {transform_indices = @transform_5, window_bounds = array<i64: 16, 128>}]} {
    %c0_i32 = arith.constant 0 : i32
    %0 = arith.cmpi eq, %arg1, %c0_i32 : i32
    %1 = arith.extui %0 : i1 to i32
    %c0_i32_0 = arith.constant 0 : i32
    %2 = arith.cmpi ne, %1, %c0_i32_0 : i32
    scf.if %2 {
      %c0_15 = arith.constant 0 : index
      %c0_16 = arith.constant 0 : index
      %19 = vector.load %arg6[%c0_15, %c0_16] : memref<1x128xf32, #tpu.memory_space<vmem>>, vector<1x128xf32>
      %20 = vector.shape_cast %19 : vector<1x128xf32> to vector<1x128xf32>
      %21 = vector.broadcast %20 : vector<1x128xf32> to vector<16x128xf32>
      %c0_17 = arith.constant 0 : index
      %c0_18 = arith.constant 0 : index
      %22 = vector.load %arg8[%c0_17, %c0_18] : memref<16x128xf32, #tpu.memory_space<vmem>>, vector<16x128xf32>
      tpu.vector_store %arg8[%c0_17, %c0_18], %21 {strides = array<i32>} : memref<16x128xf32, #tpu.memory_space<vmem>>, vector<16x128xf32>,
    } else {
    }
    %c0 = arith.constant 0 : index
    %c0_1 = arith.constant 0 : index
    %3 = vector.load %arg2[%c0, %c0_1] : memref<16x128xf32, #tpu.memory_space<vmem>>, vector<16x128xf32>
    %c0_2 = arith.constant 0 : index
    %c0_3 = arith.constant 0 : index
    %4 = vector.load %arg3[%c0_2, %c0_3] : memref<128x128xf32, #tpu.memory_space<vmem>>, vector<128x128xf32>
    %cst = arith.constant dense<0.000000e+00> : vector<16x128xf32>
    %5 = tpu.matmul %3, %4, %cst {dimension_numbers = #tpu.dot_dimension_numbers<[1], [0], [0], [1], [0, 0, 1, 1], [], []>} : vector<16x128xf32>, vector<128x128xf32>, vector<16x128xf32> -> vector<16x128xf32>
    %c0_4 = arith.constant 0 : index
    %c0_5 = arith.constant 0 : index
    %6 = vector.load %arg4[%c0_4, %c0_5] : memref<1x128xf32, #tpu.memory_space<vmem>>, vector<1x128xf32>
    %7 = vector.broadcast %6 : vector<1x128xf32> to vector<16x128xf32>
    %8 = arith.addf %5, %7 : vector<16x128xf32>
    %cst_6 = arith.constant 0.000000e+00 : f32
    %9 = vector.broadcast %cst_6 : f32 to vector<16x128xf32>
    %10 = arith.maximumf %8, %9 : vector<16x128xf32>
    %c0_7 = arith.constant 0 : index
    %c0_8 = arith.constant 0 : index
    %11 = vector.load %arg8[%c0_7, %c0_8] : memref<16x128xf32, #tpu.memory_space<vmem>>, vector<16x128xf32>
    %c0_9 = arith.constant 0 : index
    %c0_10 = arith.constant 0 : index
    %12 = vector.load %arg5[%c0_9, %c0_10] : memref<128x128xf32, #tpu.memory_space<vmem>>, vector<128x128xf32>
    %cst_11 = arith.constant dense<0.000000e+00> : vector<16x128xf32>
    %13 = tpu.matmul %10, %12, %cst_11 {dimension_numbers = #tpu.dot_dimension_numbers<[1], [0], [0], [1], [0, 0, 1, 1], [], []>} : vector<16x128xf32>, vector<128x128xf32>, vector<16x128xf32> -> vector<16x128xf32>
    %14 = arith.addf %11, %13 : vector<16x128xf32>
    %c0_12 = arith.constant 0 : index
    %c0_13 = arith.constant 0 : index
    %15 = vector.load %arg8[%c0_12, %c0_13] : memref<16x128xf32, #tpu.memory_space<vmem>>, vector<16x128xf32>
    tpu.vector_store %arg8[%c0_12, %c0_13], %14 {strides = array<i32>} : memref<16x128xf32, #tpu.memory_space<vmem>>, vector<16x128xf32>,
    %c1_i32 = arith.constant 1 : i32
    %16 = arith.cmpi eq, %arg1, %c1_i32 : i32
    %17 = arith.extui %16 : i1 to i32
    %c0_i32_14 = arith.constant 0 : i32
    %18 = arith.cmpi ne, %17, %c0_i32_14 : i32
    scf.if %18 {
      %c0_15 = arith.constant 0 : index
      %c0_16 = arith.constant 0 : index
      %19 = vector.load %arg8[%c0_15, %c0_16] : memref<16x128xf32, #tpu.memory_space<vmem>>, vector<16x128xf32>
      %c0_17 = arith.constant 0 : index
      %c0_18 = arith.constant 0 : index
      %20 = vector.load %arg7[%c0_17, %c0_18] : memref<16x128xf32, #tpu.memory_space<vmem>>, vector<16x128xf32>
      tpu.vector_store %arg7[%c0_17, %c0_18], %19 {strides = array<i32>} : memref<16x128xf32, #tpu.memory_space<vmem>>, vector<16x128xf32>,
    } else {
    }
    return
  }
  func.func @transform_0(%arg0: i32, %arg1: i32) -> (i32, i32) {
    %c0_i32 = arith.constant 0 : i32
    %c0_i32_0 = arith.constant 0 : i32
    return %arg0, %c0_i32 : i32, i32
  }
  func.func @transform_1(%arg0: i32, %arg1: i32) -> (i32, i32) {
    %c0_i32 = arith.constant 0 : i32
    %c0_i32_0 = arith.constant 0 : i32
    return %c0_i32, %arg1 : i32, i32
  }
  func.func @transform_2(%arg0: i32, %arg1: i32) -> (i32, i32) {
    %c0_i32 = arith.constant 0 : i32
    %c0_i32_0 = arith.constant 0 : i32
    return %c0_i32, %arg1 : i32, i32
  }
  func.func @transform_3(%arg0: i32, %arg1: i32) -> (i32, i32) {
    %c0_i32 = arith.constant 0 : i32
    %c0_i32_0 = arith.constant 0 : i32
    return %arg1, %c0_i32 : i32, i32
  }
  func.func @transform_4(%arg0: i32, %arg1: i32) -> (i32, i32) {
    %c0_i32 = arith.constant 0 : i32
    %c0_i32_0 = arith.constant 0 : i32
    %c0_i32_1 = arith.constant 0 : i32
    return %c0_i32, %c0_i32_0 : i32, i32
  }
  func.func @transform_5(%arg0: i32, %arg1: i32) -> (i32, i32) {
    %c0_i32 = arith.constant 0 : i32
    %c0_i32_0 = arith.constant 0 : i32
    return %arg0, %c0_i32 : i32, i32
  }
}

</mosaic_0001>

<bundles_post_ra>
// kernel: feed_forward.1
= control target key start
LH: loop header
LB: loop body
LE: loop exit
PB: predicated region body
PF: predicated region fallthrough
CT: control target
= control target key end

     0   :  { %10 = vsyncpa [#allocation4], 0  ;;  %s1098_s0 = inlined_call_operand.hbm [shape: f32[16,128], index: 0, kind: input, shape index: {}]   ;;  %s1099_s1 = inlined_call_operand.hbm [shape: f32[128,256], index: 1, kind: input, shape index: {}]   ;;  %s1100_s2 = inlined_call_operand.vmem [shape: f32[1,256], index: 2, kind: input, shape index: {}]   ;;  %s1101_s3 = inlined_call_operand.hbm [shape: f32[256,128], index: 3, kind: input, shape index: {}]   ;;  %s1102_s4 = inlined_call_operand.vmem [shape: f32[1,128], index: 4, kind: input, shape index: {}]   ;;  %s1103_s5 = inlined_call_operand.hbm [shape: f32[16,128], index: 5, kind: output, shape index: {}]  }
   0x1   :  { %11 = vsyncpa [#allocation7], 0 }
   0x2   :  { %13 = vsyncpa [#allocation7 + $0x1], 0 }
   0x3   :  { %14 = vsyncpa [#allocation5], 0  ;;  %s910_s18 = smov 0   ;;  %s912_s19 = smov 0  }
   0x4   :  { %s914_s20 = smov 0   ;;  %s916_s21 = smov 0  }
   0x5   :  { %s918_s22 = smov 0   ;;  %s920_s23 = smov 0  }
   0x6 LB: > { %s29_s24 = sadd.s32 1, %s867_s22  ;;  %s65_s25 = sadd.s32 1, %s859_s20  ;;  %s871_s23 = sphi %s920_s23, %s20_s23   ;;  %s867_s22 = sphi %s918_s22, %s1112_s22   ;;  %s863_s21 = sphi %s916_s21, %s1111_s21   ;;  %s859_s20 = sphi %s914_s20, %s1110_s20   ;;  %s855_s19 = sphi %s912_s19, %s1109_s19   ;;  %s851_s18 = sphi %s910_s18, %s1108_s18  }
   0x7   : > { %p30_p0 = scmp.ge.s32.totalorder %s29_s24, 2  ;;  %p72_p1 = scmp.ne.s32.totalorder %s859_s20, %s855_s19 }
   0x8   : > { %p73_p2 = scmp.eq.s32.totalorder %s871_s23, 0  ;;  %p634_p5 = scmp.lt.s32.totalorder %s871_s23, 2 }
   0x9   : > { %s1114_s24 = smov (%p30_p0, %s29_s24), 0  ;;  %s221_s28 = sand.u32 1, %s871_s23  }
   0xa   : > { %p947_p3 = por %p73_p2, %p72_p1  ;;  %s62_s27 = ssub.s32 %s867_s22, %s1114_s24 }
   0xb   : > { %p63_p4 = scmp.eq.s32.totalorder %s62_s27, 0  ;;  %s223_s29 = sand.u32 1, %s859_s20  }
   0xc   : > { %s959_s6 = sshll.u32 %s223_s29, 7  ;;  %s563_s7 = sshll.u32 %s867_s22, 3 }
   0xd   : > { %s957_s30 = scalar_select %p63_p4, %s859_s20, %s65_s25  }
   0xe   : > { %s229_s10 = scalar_lea.hbm %s1099_s1, %s563_s7  ;;  %s225_s11 = scalar_lea.vmem [#allocation6], %s959_s6 }
   0xf   : > { %s232_s12 = sshll.u32 %s225_s11, 4  ;;  %s230_s13 = sshll.u32 %s229_s10, 4  ;;  %s233_s12 = int_to_ptr.vmem [resolvable:$true] %s232_s12  ;;  %s231_s13 = int_to_ptr.hbm [resolvable:$true] %s230_s13 }
  0x10   : > { %p968_p6 = pnand %p634_p5, %p947_p3  ;;  %s972_s15 = scalar_lea.sflag [#allocation7], %s221_s28 }
  0x11   : > { %s873_s16 = smov 256   ;;  %s874_s17 = smov 128  }
  0x12   : > { %s875_s25 = smov 8   ;;  %s978_s27 = sadd.s32 4294967295, %s871_s23  }
  0x13   : > { %629 = dma.hbm_to_vmem [thread:$0]  (!%p968_p6), %s231_s13, 2048, %s233_s12, %s972_s15, %s873_s16, %s874_s17, %s875_s25  }
  0x14   : > { %p78_p7 = scmp.ne.s32.totalorder %s855_s19, %s851_s18  ;;  %p79_p8 = scmp.eq.s32.totalorder %s978_s27, 0 }
  0x15   : > { %p559_p9 = scmp.ge.s32.totalorder %s871_s23, 1  ;;  %p188_p10 = scmp.lt.s32.totalorder %s871_s23, 3 }
  0x16   : > { %p987_p11 = por %p79_p8, %p78_p7  ;;  %s202_s7 = sshll.u32 %s1098_s0, 4  ;;  %s203_s7 = int_to_ptr.hbm [resolvable:$true] %s202_s7 }
  0x17   : > { %p994_p12 = pnand %p559_p9, %p188_p10  ;;  %s876_s18 = smov [#allocation3]  }
  0x18   : > { %s204_s9 = sshll.u32 %s876_s18, 4  ;;  %s577_s10 = sshll.u32 %s867_s22, 7  ;;  %s205_s9 = int_to_ptr.vmem [resolvable:$true] %s204_s9 }
  0x19   : > { %p622_p13 = pneg %p994_p12  ;;  %s257_s13 = scalar_lea.hbm %s1101_s3, %s577_s10 }
  0x1a   : > { %s258_s16 = sshll.u32 %s257_s13, 4  ;;  %s252_s28 = scalar_lea.vmem [#allocation8], %s959_s6  ;;  %s259_s16 = int_to_ptr.hbm [resolvable:$true] %s258_s16 }
  0x1b   : > { %p623_p0 = pnand %p622_p13, %p79_p8  ;;  %s260_s29 = sshll.u32 %s252_s28, 4  ;;  %s261_s29 = int_to_ptr.vmem [resolvable:$true] %s260_s29 }
  0x1c   : > { %632 = dma.hbm_to_vmem [thread:$0]  (!%p968_p6), %s259_s16, 2048, %s261_s29, %s972_s15, %s874_s17, %s874_s17, %s875_s25  }
  0x1d   : > { %625 = dma.hbm_to_vmem [thread:$0]  (!%p623_p0), %s203_s7, 256, %s205_s9, [#allocation4], %s874_s17, %s874_s17, %s875_s25  }
  0x1e   : > { %272 = sbr.rel (%p994_p12) target bundleno = 368 (0x170), region = 40 }
  0x23   : > { %838 = dma.done.wait (%p79_p8), [#allocation4], 256  }
  0x24   : > { %840 = vsyncadd (%p79_p8), [#allocation4], 4294967040  ;;  %s279_s18 = sand.u32 1, %s978_s27   ;;  %s281_s6 = sand.u32 1, %s855_s19  }
  0x25   : > { %s569_s10 = sshll.u32 %s281_s6, 7  ;;  %s280_s11 = scalar_lea.sflag [#allocation7], %s279_s18 }
  0x26   : > { %s1018_s7 = scalar_lea.vmem [#allocation6], %s569_s10 }
  0x27   : > { %842 = dma.done.wait (%p987_p11), %s280_s11, 4096  }
  0x28   : > { %844 = vsyncadd (%p987_p11), %s280_s11, 4294963200  ;;  %p325_p1 = scmp.lt.s32.totalorder %s863_s21, 1  ;;  %s1032_s8 = scalar_lea.vmem [#allocation8], %s569_s10 }
  0x29   : > { %p571_p2 = scmp.ne.s32.totalorder %s863_s21, 0 }
  0x2a   : > { %s1026_s14 = scalar_select %p325_p1, %s863_s21, 1 }
  0x2b   : > { %333 = sbr.rel (%p571_p2) target bundleno = 51 (0x33), region = 56 }
  0x2c   : > { %s327_s25 = scalar_lea.vmem %s1100_s2, %s1026_s14 }
  0x30   : > { %v693_v0 = vld [vmem:[%s1102_s4] ss:$0 sm:$0xff] }
  0x31   : > { %338 = vst [vmem:[#allocation2] sm:$0xff] %v693_v0 }
  0x32   : > { %339 = vst [vmem:[#allocation2 + $0x8] sm:$0xff] %v693_v0 }
  0x33 PF: > { %v357_v1 = vld [vmem:[%s1018_s7 + $0x78] sm:$0xff]  ;;  %v356_v2 = vld [vmem:[%s1018_s7 + $0x70] sm:$0xff]  ;;  %v355_v3 = vld [vmem:[%s1018_s7 + $0x68] sm:$0xff]  ;;  %p572_p3 = scmp.ne.s32.totalorder %s863_s21, 1 }
  0x34   : > { %578 = vmatpush.msra.mxu2 %v357_v1  ;;  %362 = vmatpush.msra.mxu0 %v357_v1  ;;  %v354_v4 = vld [vmem:[%s1018_s7 + $0x60] sm:$0xff]  ;;  %v353_v5 = vld [vmem:[%s1018_s7 + $0x58] sm:$0xff]  ;;  %v403_v7 = vld [vmem:[%s1032_s8 + $0x70] sm:$0xff] }
  0x35   : > { %v404_v6 = vld [vmem:[%s1032_s8 + $0x78] sm:$0xff]  ;;  %v352_v8 = vld [vmem:[%s1018_s7 + $0x50] sm:$0xff]  ;;  %v402_v9 = vld [vmem:[%s1032_s8 + $0x68] sm:$0xff] }
  0x36   : > { %579 = vmatpush.msra.mxu2 %v356_v2  ;;  %363 = vmatpush.msra.mxu0 %v356_v2  ;;  %v351_v10 = vld [vmem:[%s1018_s7 + $0x48] sm:$0xff]  ;;  %v401_v11 = vld [vmem:[%s1032_s8 + $0x60] sm:$0xff]  ;;  %v400_v13 = vld [vmem:[%s1032_s8 + $0x58] sm:$0xff] }
  0x37   : > { %594 = vmatpush.msra.mxu3 %v404_v6  ;;  %405 = vmatpush.msra.mxu1 %v404_v6  ;;  %v350_v12 = vld [vmem:[%s1018_s7 + $0x40] sm:$0xff]  ;;  %v349_v14 = vld [vmem:[%s1018_s7 + $0x38] sm:$0xff]  ;;  %v399_v15 = vld [vmem:[%s1032_s8 + $0x50] sm:$0xff] }
  0x38   : > { %580 = vmatpush.msra.mxu2 %v355_v3  ;;  %364 = vmatpush.msra.mxu0 %v355_v3  ;;  %v348_v16 = vld [vmem:[%s1018_s7 + $0x30] sm:$0xff]  ;;  %v398_v17 = vld [vmem:[%s1032_s8 + $0x48] sm:$0xff]  ;;  %v397_v19 = vld [vmem:[%s1032_s8 + $0x40] sm:$0xff] }
  0x39   : > { %595 = vmatpush.msra.mxu3 %v403_v7  ;;  %406 = vmatpush.msra.mxu1 %v403_v7  ;;  %v347_v18 = vld [vmem:[%s1018_s7 + $0x28] sm:$0xff]  ;;  %v346_v20 = vld [vmem:[%s1018_s7 + $0x20] sm:$0xff]  ;;  %v396_v21 = vld [vmem:[%s1032_s8 + $0x38] sm:$0xff] }
  0x3a   : > { %581 = vmatpush.msra.mxu2 %v354_v4  ;;  %365 = vmatpush.msra.mxu0 %v354_v4  ;;  %v345_v22 = vld [vmem:[%s1018_s7 + $0x18] sm:$0xff]  ;;  %v395_v23 = vld [vmem:[%s1032_s8 + $0x30] sm:$0xff]  ;;  %v394_v25 = vld [vmem:[%s1032_s8 + $0x28] sm:$0xff] }
  0x3b   : > { %596 = vmatpush.msra.mxu3 %v402_v9  ;;  %407 = vmatpush.msra.mxu1 %v402_v9  ;;  %v344_v24 = vld [vmem:[%s1018_s7 + $0x10] sm:$0xff]  ;;  %v343_v26 = vld [vmem:[%s1018_s7 + $0x8] sm:$0xff]  ;;  %v393_v27 = vld [vmem:[%s1032_s8 + $0x20] sm:$0xff] }
  0x3c   : > { %582 = vmatpush.msra.mxu2 %v353_v5  ;;  %366 = vmatpush.msra.mxu0 %v353_v5  ;;  %v342_v28 = vld [vmem:[%s1018_s7] sm:$0xff]  ;;  %v341_v29 = vld [vmem:[#allocation3 + $0x8] sm:$0xff]  ;;  %v340_v30 = vld [vmem:[#allocation3] sm:$0xff] }
  0x3d   : > { %597 = vmatpush.msra.mxu3 %v401_v11  ;;  %408 = vmatpush.msra.mxu1 %v401_v11  ;;  %v392_v31 = vld [vmem:[%s1032_s8 + $0x18] sm:$0xff]  ;;  %v391_v32 = vld [vmem:[%s1032_s8 + $0x10] sm:$0xff]  ;;  %v390_v33 = vld [vmem:[%s1032_s8 + $0x8] sm:$0xff] }
  0x3e   : > { %583 = vmatpush.msra.mxu2 %v352_v8  ;;  %367 = vmatpush.msra.mxu0 %v352_v8  ;;  %v389_v34 = vld [vmem:[%s1032_s8] sm:$0xff]  ;;  %v388_v45 = vld [vmem:[#allocation2 + $0x8] sm:$0xff] }
  0x3f   : > { %598 = vmatpush.msra.mxu3 %v400_v13  ;;  %409 = vmatpush.msra.mxu1 %v400_v13  ;;  %v694_v35 = vld [vmem:[%s327_s25] ss:$0 sm:$0xff] }
  0x40   : > { %584 = vmatpush.msra.mxu2 %v351_v10  ;;  %368 = vmatpush.msra.mxu0 %v351_v10  ;;  %v387_v42 = vld [vmem:[#allocation2] sm:$0xff] }
  0x41   : > { %599 = vmatpush.msra.mxu3 %v399_v15  ;;  %410 = vmatpush.msra.mxu1 %v399_v15 }
  0x42   : > { %585 = vmatpush.msra.mxu2 %v350_v12  ;;  %369 = vmatpush.msra.mxu0 %v350_v12 }
  0x43   : > { %600 = vmatpush.msra.mxu3 %v398_v17  ;;  %411 = vmatpush.msra.mxu1 %v398_v17 }
  0x44   : > { %586 = vmatpush.msra.mxu2 %v349_v14  ;;  %370 = vmatpush.msra.mxu0 %v349_v14 }
  0x45   : > { %601 = vmatpush.msra.mxu3 %v397_v19  ;;  %412 = vmatpush.msra.mxu1 %v397_v19 }
  0x46   : > { %587 = vmatpush.msra.mxu2 %v348_v16  ;;  %371 = vmatpush.msra.mxu0 %v348_v16 }
  0x47   : > { %602 = vmatpush.msra.mxu3 %v396_v21  ;;  %413 = vmatpush.msra.mxu1 %v396_v21 }
  0x48   : > { %588 = vmatpush.msra.mxu2 %v347_v18  ;;  %372 = vmatpush.msra.mxu0 %v347_v18 }
  0x49   : > { %603 = vmatpush.msra.mxu3 %v395_v23  ;;  %414 = vmatpush.msra.mxu1 %v395_v23 }
  0x4a   : > { %589 = vmatpush.msra.mxu2 %v346_v20  ;;  %373 = vmatpush.msra.mxu0 %v346_v20 }
  0x4b   : > { %604 = vmatpush.msra.mxu3 %v394_v25  ;;  %415 = vmatpush.msra.mxu1 %v394_v25 }
  0x4c   : > { %590 = vmatpush.msra.mxu2 %v345_v22  ;;  %374 = vmatpush.msra.mxu0 %v345_v22 }
  0x4d   : > { %605 = vmatpush.msra.mxu3 %v393_v27  ;;  %416 = vmatpush.msra.mxu1 %v393_v27 }
  0x4e   : > { %591 = vmatpush.msra.mxu2 %v344_v24  ;;  %375 = vmatpush.msra.mxu0 %v344_v24 }
  0x4f   : > { %606 = vmatpush.msra.mxu3 %v392_v31  ;;  %417 = vmatpush.msra.mxu1 %v392_v31 }
  0x50   : > { %592 = vmatpush.msra.mxu2 %v343_v26  ;;  %376 = vmatpush.msra.mxu0 %v343_v26 }
  0x51   : > { %607 = vmatpush.msra.mxu3 %v391_v32  ;;  %418 = vmatpush.msra.mxu1 %v391_v32 }
  0x52   : > { %593 = vmatpush.msra.mxu2 %v342_v28  ;;  %377 = vmatpush.msra.mxu0 %v342_v28 }
  0x53   : > { %381 = vmatmul.f32.vlgmr.msra.gmra.mxu2 %v341_v29  ;;  %378 = vmatmul.f32.vlgmr.msra.gmra.mxu0 %v340_v30 }
  0x54   : > { %608 = vmatpush.msra.mxu3 %v390_v33  ;;  %419 = vmatpush.msra.mxu1 %v390_v33 }
  0x56   : > { %609 = vmatpush.msra.mxu3 %v389_v34  ;;  %420 = vmatpush.msra.mxu1 %v389_v34 }
  0xd0   : > { %v379_v36 = vpop.f32.mrf.mxu0 }
  0xd1   : > { %v380_v37 = vadd.f32 %v694_v35, %v379_v36 }
  0xd3   : > { %v385_v38 = vmax.f32 %v380_v37, 0.0 }
  0xd5   : > { %421 = vmatmul.f32.vlgmr.msra.gmra.mxu1 %v385_v38 }
  0xd6   : > { %v382_v39 = vpop.f32.mrf.mxu2 }
  0xd7   : > { %v383_v40 = vadd.f32 %v694_v35, %v382_v39 }
  0xd9   : > { %v386_v41 = vmax.f32 %v383_v40, 0.0 }
  0xdb   : > { %424 = vmatmul.f32.vlgmr.msra.gmra.mxu3 %v386_v41 }
 0x152   : > { %v422_v43 = vpop.f32.mrf.mxu1 }
 0x153   : > { %v428_v44 = vadd.f32 %v422_v43, %v387_v42 }
 0x155   : > { %430 = vst [vmem:[#allocation2] sm:$0xff] %v428_v44 }
 0x15d   : > { %435 = sbr.rel (%p572_p3) target bundleno = 362 (0x16a), region = 60 }
 0x15e   : > { %v425_v46 = vpop.f32.mrf.mxu3 }
 0x15f   : > { %v429_v47 = vadd.f32 %v425_v46, %v388_v45 }
 0x161   : > { %431 = vst [vmem:[#allocation2 + $0x8] sm:$0xff] %v429_v47 }
 0x162   : > { %v436_v48 = vld [vmem:[#allocation2] sm:$0xff] }
 0x163   : > { %438 = vst [vmem:[#allocation9] sm:$0xff] %v436_v48 }
 0x168   : > { %v437_v49 = vld [vmem:[#allocation2 + $0x8] sm:$0xff] }
 0x169   : > { %439 = vst [vmem:[#allocation9 + $0x8] sm:$0xff] %v437_v49 }
 0x16a PF: > { %p636_p4 = scmp.eq.s32.totalorder %s978_s27, 1  ;;  %s450_s29 = sshll.u32 %s1103_s5, 4  ;;  %s451_s29 = int_to_ptr.hbm [resolvable:$true] %s450_s29 }
 0x16b   : > { %s877_s18 = smov [#allocation9]   ;;  %s878_s10 = smov 128  }
 0x16c   : > { %s448_s6 = sshll.u32 %s877_s18, 4  ;;  %s879_s11 = smov 8   ;;  %s449_s6 = int_to_ptr.vmem [resolvable:$true] %s448_s6 }
 0x16d   : > { %619 = dma.vmem_to_hbm [thread:$0]  (%p636_p4), %s449_s6, 256, %s451_s29, [#allocation5], %s878_s10, %s878_s10, %s879_s11  }
 0x16e   : > { %846 = dma.done.wait (%p636_p4), [#allocation5], 256  }
 0x16f   : > { %848 = vsyncadd (%p636_p4), [#allocation5], 4294967040 }
 0x170 PF: > { %s20_s23 = sadd.s32 1, %s871_s23   ;;  %s1108_s18 = smov %s855_s19 }
 0x171   : > { %p17_p5 = scmp.ge.s32.totalorder %s20_s23, 4   ;;  %s1109_s19 = smov %s859_s20 }
 0x172   : > { %s1110_s20 = smov %s957_s30  ;;  %s1111_s21 = smov %s867_s22 }
 0x173   : > { %s1112_s22 = smov %s1114_s24  ;;  %19 = sbr.rel (!%p17_p5) target bundleno = 6 (0x6), region = 106 }
 0x178   :  { %467 = vsyncpa [#allocation4], 1 }
 0x179   :  { %469 = vsyncpa [#allocation4 + $0x1], 1 }
 0x17a   :  { %470 = vsyncpa [#allocation7], 1 }
 0x17b   :  { %472 = vsyncpa [#allocation7 + $0x1], 1 }
 0x17c   :  { %473 = vsyncpa [#allocation5], 1 }
 0x17d   :  { %475 = vsyncpa [#allocation5 + $0x1], 1 }

</bundles_post_ra>
